<compile_context>
chip_gen: v6e
topology: v6e:2x2x1
jax: 0.10.0
libtpu: 0.0.40
codegen_flags: <defaults>
</compile_context>

<pallas_src>
import numpy as np
import jax
import jax.numpy as jnp
from jax import lax
from jax.experimental import pallas as pl
from jax.experimental.pallas import tpu as pltpu


def _pow(x, zeta):
    """Mirror of the torch.jit.script `pow` helper (special-cased integer powers)."""
    if zeta == 1:
        return x
    elif zeta == 2:
        return x * x
    elif zeta == 3:
        return x * x * x
    elif zeta == 4:
        y = x * x
        return y * y
    else:
        return x ** zeta


def _round_up(x, m):
    return ((x + m - 1) // m) * m


def _cdiv(a, b):
    return (a + b - 1) // b


def _pad2d(x, rows, cols):
    if x.shape == (rows, cols):
        return x
    return jnp.pad(x, ((0, rows - x.shape[0]), (0, cols - x.shape[1])))


def _vmem_limit_bytes():
    """Scoped-VMEM limit sized from the chip (v5e/v6e: 128 MiB, v7x: 64 MiB)."""
    try:
        cap = int(pltpu.get_tpu_info().vmem_capacity_bytes)
    except Exception:
        cap = 64 * 1024 * 1024
    return max(32 * 1024 * 1024, int(min(0.9 * cap, 112 * 1024 * 1024)))


def _is_dual_core():
    """True on chips with 2 TensorCores (v4 / v5p megacore, v7x)."""
    try:
        kind = jax.devices()[0].device_kind.lower()
    except Exception:
        return False
    return any(tag in kind for tag in ("v4", "v5p", "v7"))


def _choose_tiling(n_env, n_feat, total_cols, n_struct, ps_in_itemsize, ci,
                   budget, dual_core, env_splits_req):
    granule_m = 16 if ci < 4 else 8
    n_struct_p = _round_up(max(int(n_struct), 1), 8)
    feat_full = _round_up(n_feat, 128)
    cols_full = _round_up(total_cols, 128)

    # --- columns / features: keep S_all.T fully VMEM-resident whenever it fits -----------
    if 2 * feat_full * cols_full * ci <= 0.4 * budget:
        tk, nk = feat_full, 1              # single feat chunk -> S fetched exactly once
        tcol, n_col_tiles = cols_full, 1   # single column tile -> PS read exactly once
    else:
        tk_cap = min(feat_full, 512)
        nk = _cdiv(n_feat, tk_cap)
        tk = _round_up(_cdiv(n_feat, nk), 128)
        s_tile_elems = max(128 * 128, int(0.3 * budget) // (2 * ci))
        tcol_cap = min(cols_full, max(128, (s_tile_elems // tk) // 128 * 128))
        n_col_tiles = _cdiv(total_cols, tcol_cap)
        tcol = _round_up(_cdiv(total_cols, n_col_tiles), 128)
    n_feat_p = nk * tk
    cols_p = n_col_tiles * tcol

    # --- env tile size from the remaining VMEM budget ------------------------------------
    fixed = 2 * tk * tcol * ci                 # S.T tile (double-buffered)
    fixed += 2 * n_struct_p * tcol * 4         # resident output block
    per_row = 2 * tk * ps_in_itemsize          # PS tile (double-buffered)
    per_row += tcol * (4 + ci + 8)             # c_acc + c_mask + epilogue temporaries headroom
    per_row += n_struct_p * ci + 32            # one-hot scratch + z/batch slivers
    tm_cap = max(granule_m, min(1024, (budget - fixed) // per_row))

    if env_splits_req is None:
        # Give the second TensorCore (v4/v5p/v7x) something to do when there is only one
        # column tile; a no-op on single-core chips and for small problems.
        env_splits = 2 if (dual_core and n_col_tiles == 1 and n_env >= 256) else 1
    else:
        env_splits = max(1, int(env_splits_req))

    ntiles = _cdiv(_cdiv(n_env, env_splits), tm_cap)
    total_env_tiles = env_splits * ntiles
    if total_env_tiles == 1:
        tm = _round_up(n_env, granule_m)       # single tile: block == full padded env dim
    else:
        # multi-tile: tm must be lane-aligned (the structure-id row is blocked as (1, tm))
        tm = _round_up(_cdiv(n_env, total_env_tiles), 128)
    n_env_p = total_env_tiles * tm

    return dict(tm=tm, tk=tk, tcol=tcol, nk=nk, n_col_tiles=n_col_tiles,
                env_splits=env_splits, env_tiles_per_split=ntiles,
                n_env_p=n_env_p, n_feat_p=n_feat_p, cols_p=cols_p, n_struct_p=n_struct_p)


def _make_kernel(zeta, compute_dtype, n_feat_chunks, cast_ps):
    """K_all column-tile accumulated over (env-tile, feat-chunk) reduction axes."""

    def kernel(ps_ref, st_ref, z_ref, batch_ref, colsp_ref, out_ref,
               c_acc, c_mask, w_scr):
        e = pl.program_id(2)          # env-tile index   (reduction for K_all)
        k = pl.program_id(3)          # feat-chunk index (reduction for C)

        # out_ref's block index is constant over (e, k): it stays VMEM-resident for the
        # whole (split, column-tile) group, so accumulate straight into it.
        @pl.when(jnp.logical_and(e == 0, k == 0))
        def _init():
            out_ref[...] = jnp.zeros(out_ref.shape, out_ref.dtype)

        a = ps_ref[...]
        if cast_ps:
            a = a.astype(compute_dtype)       # per-tile cast: saves one full HBM pass over PS
        partial = jnp.dot(a, st_ref[...], preferred_element_type=jnp.float32)

        if n_feat_chunks == 1:
            c_acc[...] = partial              # no zero-fill / '+=' round-trip
        else:
            @pl.when(k == 0)
            def _first():
                c_acc[...] = partial          # assign on the first chunk (no zero-fill)

            @pl.when(k != 0)
            def _rest():
                c_acc[...] += partial

        def epilogue():
            # pow first, then a *select* against the per-(atom, column) species mask: a NaN
            # from a generic (non-integer) zeta on a masked-out negative base can never leak
            # into the result, and masked entries are exactly 0 — matching the PyTorch module.
            p = _pow(c_acc[...], zeta)                       # (tm, tcol) f32, VPU/EUP
            keep = z_ref[...] == colsp_ref[...]              # (tm, 1) == (1, tcol)
            c_mask[...] = jnp.where(keep, p, 0.0).astype(c_mask.dtype)

            # Structure one-hot built in-kernel (cheap VPU filler); explicit compute_dtype
            # cast so the tiny second matmul is a single clean MXU pass (bf16 by default).
            s_iota = lax.broadcasted_iota(jnp.int32, w_scr.shape, 0)
            w_scr[...] = (s_iota == batch_ref[...]).astype(w_scr.dtype)

            # K_all[b, c] += sum_i w[b, i] * Cz[i, c]
            out_ref[...] += lax.dot_general(
                w_scr[...], c_mask[...],
                dimension_numbers=(((1,), (0,)), ((), ())),
                preferred_element_type=jnp.float32)

        if n_feat_chunks == 1:
            epilogue()
        else:
            pl.when(k == n_feat_chunks - 1)(epilogue)

    return kernel


def sparse_cosine_kernel_forward(PS, z, batch, n_atoms, sparse_points, sp_map, zeta, *,
                                 compute_dtype=jnp.bfloat16,
                                 env_splits=None,
                                 vmem_tile_budget_bytes=None):
    """JAX/Pallas equivalent of SparseCosineKernel.forward(PS, data)."""
    PS = jnp.asarray(PS)
    n_env, n_feat = PS.shape
    n_struct = int(np.asarray(n_atoms).shape[0])
    sparse_points = jnp.asarray(sparse_points)
    n_sparse = int(sparse_points.shape[0])
    out_dtype = PS.dtype

    # torch.unique() over the concrete species labels (host-side, like the original module).
    # TODO(synk): species enumeration + per-species sp_map gather are host-side (data-dependent
    # shapes); a fully traced variant needs the species/column layout as static metadata.
    z_np = np.asarray(z)
    species = sorted(np.unique(z_np).tolist())

    s_rows, col_species, col_within = [], [], []
    for sp in species:
        idx = np.asarray(sp_map[sp]).astype(np.int32)
        s_rows.append(sparse_points[jnp.asarray(idx)])
        col_species.append(np.full((idx.shape[0],), sp, dtype=np.int32))
        col_within.append(np.arange(idx.shape[0], dtype=np.int32))
    S_all = jnp.concatenate(s_rows, axis=0)                   # (total_cols, n_feat)
    col_species = np.concatenate(col_species)
    col_within = np.concatenate(col_within)
    total_cols = int(S_all.shape[0])

    ci = jnp.dtype(compute_dtype).itemsize
    ps_in_itemsize = max(jnp.dtype(PS.dtype).itemsize, ci)
    vmem_limit = _vmem_limit_bytes()
    budget = int(vmem_tile_budget_bytes) if vmem_tile_budget_bytes else int(0.75 * vmem_limit)

    t = _choose_tiling(n_env, n_feat, total_cols, n_struct, ps_in_itemsize, ci,
                       budget, _is_dual_core(), env_splits)
    tm, tk, tcol = t["tm"], t["tk"], t["tcol"]
    nk, n_col_tiles = t["nk"], t["n_col_tiles"]
    splits, ne_sub = t["env_splits"], t["env_tiles_per_split"]
    n_env_p, n_feat_p = t["n_env_p"], t["n_feat_p"]
    cols_p, n_struct_p = t["cols_p"], t["n_struct_p"]

    # ---- operands (zero padding is inert: masked out by species / structure selects) ----
    need_pad_ps = (n_env_p != n_env) or (n_feat_p != n_feat)
    cast_ps_in_kernel = ((not need_pad_ps) and (n_col_tiles <= 2)
                         and (PS.dtype != jnp.dtype(compute_dtype)))
    if cast_ps_in_kernel:
        ps_p = PS                                             # streamed once, cast per-tile in VMEM
    else:
        ps_p = _pad2d(PS.astype(compute_dtype), n_env_p, n_feat_p)
    st_p = _pad2d(S_all.astype(compute_dtype).T, n_feat_p, cols_p)   # (n_feat_p, cols_p)
    z_p = jnp.pad(jnp.asarray(z, jnp.int32), (0, n_env_p - n_env),
                  constant_values=-1).reshape(n_env_p, 1)
    batch_p = jnp.pad(jnp.asarray(batch, jnp.int32), (0, n_env_p - n_env),
                      constant_values=-1).reshape(1, n_env_p)
    colsp_p = jnp.pad(jnp.asarray(col_species), (0, cols_p - total_cols),
                      constant_values=-2).reshape(1, cols_p)

    grid = (splits, n_col_tiles, ne_sub, nk)

    # Realistic cost hint: PS is re-read once per column tile, S once per env tile when the
    # feature axis is chunked, output is one f32 slab per split.
    ps_stream_bytes = jnp.dtype(ps_p.dtype).itemsize
    s_refetch = 1 if nk == 1 else splits * ne_sub
    flops = 2 * n_env_p * n_feat_p * cols_p + 2 * n_struct_p * n_env_p * cols_p
    bytes_accessed = (n_env_p * n_feat_p * ps_stream_bytes * n_col_tiles
                      + n_feat_p * cols_p * ci * s_refetch
                      + splits * n_struct_p * cols_p * 4
                      + (2 * n_env_p + cols_p) * 4)
    trans = 0 if zeta in (1, 2, 3, 4) else n_env_p * cols_p
    cost = pl.CostEstimate(flops=int(flops), transcendentals=int(trans),
                           bytes_accessed=int(bytes_accessed))

    kernel = _make_kernel(zeta, compute_dtype, nk, cast_ps_in_kernel)

    k_all = pl.pallas_call(
        kernel,
        out_shape=jax.ShapeDtypeStruct((splits, n_struct_p, cols_p), jnp.float32),
        grid_spec=pltpu.PrefetchScalarGridSpec(
            num_scalar_prefetch=0,
            grid=grid,
            in_specs=[
                pl.BlockSpec((tm, tk), lambda s, c, e, k: (s * ne_sub + e, k)),    # PS tile
                pl.BlockSpec((tk, tcol), lambda s, c, e, k: (k, c)),               # S_all.T tile
                pl.BlockSpec((tm, 1), lambda s, c, e, k: (s * ne_sub + e, 0)),     # atom species
                pl.BlockSpec((1, tm), lambda s, c, e, k: (0, s * ne_sub + e)),     # atom -> structure
                pl.BlockSpec((1, tcol), lambda s, c, e, k: (0, c)),                # column species
            ],
            out_specs=pl.BlockSpec((None, n_struct_p, tcol), lambda s, c, e, k: (s, 0, c)),
            scratch_shapes=[
                pltpu.VMEM((tm, tcol), jnp.float32),         # C accumulator over feat chunks
                pltpu.VMEM((tm, tcol), compute_dtype),       # pow + species-masked C (2nd MXU operand)
                pltpu.VMEM((n_struct_p, tm), compute_dtype), # structure one-hot
            ]),
        compiler_params=pltpu.CompilerParams(
            dimension_semantics=("parallel", "parallel", "arbitrary", "arbitrary"),
            vmem_limit_bytes=vmem_limit),
        cost_estimate=cost,
    )(ps_p, st_p, z_p, batch_p, colsp_p)

    # Sum the per-core-split partial slabs, then fold the fused per-species column blocks into
    # k_mat's *leading* columns with ONE scatter-add (faithful to torch_scatter's `out=k_mat`
    # accumulation semantics).
    k_all = jnp.sum(k_all, axis=0)[:n_struct, :total_cols]
    k_mat = jnp.zeros((n_struct, n_sparse), dtype=jnp.float32)
    k_mat = k_mat.at[:, jnp.asarray(col_within)].add(k_all)
    return k_mat.astype(out_dtype)


def _reference_numpy(PS, z, batch, n_atoms, sparse_points, sp_map, zeta):
    """Pure-numpy transcription of the PyTorch forward (for a correctness check)."""
    PS = np.asarray(PS, dtype=np.float64)
    z = np.asarray(z)
    batch = np.asarray(batch)
    S = np.asarray(sparse_points, dtype=np.float64)
    n_struct = int(np.asarray(n_atoms).shape[0])
    k = np.zeros((n_struct, S.shape[0]), dtype=np.float64)
    for sp in sorted(np.unique(z).tolist()):
        mask = z == sp
        S_sp = S[np.asarray(sp_map[sp])]
        kp = _pow(PS[mask] @ S_sp.T, zeta)
        for row, b in zip(kp, batch[mask]):
            k[int(b), : kp.shape[1]] += row
    return k


if __name__ == "__main__":
    key = jax.random.PRNGKey(0)
    k1, k2, k3, k4, k5, k6 = jax.random.split(key, 6)

    # ---- test 1: small problem, strict f32 path + default bf16 path ----------------------
    n_struct, aps = 2, 8
    n_env, n_feat, n_sparse, zeta = n_struct * aps, 32, 16, 2
    PS = jax.random.normal(k1, (n_env, n_feat), dtype=jnp.float32)
    sparse_points = jax.random.normal(k2, (n_sparse, n_feat), dtype=jnp.float32)
    z = jnp.array([1, 2] * aps, dtype=jnp.int32)
    batch = jnp.repeat(jnp.arange(n_struct, dtype=jnp.int32), aps)
    n_atoms = jnp.full((n_struct,), aps, dtype=jnp.int32)
    sp_map = {1: np.arange(0, 8), 2: np.arange(8, 16)}
    ref = _reference_numpy(PS, z, batch, n_atoms, sparse_points, sp_map, zeta)

    out = jax.block_until_ready(
        sparse_cosine_kernel_forward(PS, z, batch, n_atoms, sparse_points, sp_map, zeta,
                                     compute_dtype=jnp.float32))
    np.testing.assert_allclose(np.asarray(out), ref, rtol=1e-4, atol=1e-4)

    out = jax.block_until_ready(
        sparse_cosine_kernel_forward(PS, z, batch, n_atoms, sparse_points, sp_map, zeta))
    np.testing.assert_allclose(np.asarray(out), ref, rtol=5e-2, atol=5e-1)

    # ---- test 2: resident-S fast path, multiple env tiles + forced 2-way core split ------
    n_struct, aps = 3, 200
    n_env, n_feat, zeta = n_struct * aps, 256, 2
    PS = jax.random.normal(k3, (n_env, n_feat), dtype=jnp.float32)
    sparse_points = jax.random.normal(k4, (384, n_feat), dtype=jnp.float32)
    z = jnp.tile(jnp.array([1, 2, 3], dtype=jnp.int32), n_env // 3)
    batch = jnp.repeat(jnp.arange(n_struct, dtype=jnp.int32), aps)
    n_atoms = jnp.full((n_struct,), aps, dtype=jnp.int32)
    sp_map = {1: np.arange(0, 128), 2: np.arange(128, 256), 3: np.arange(256, 384)}
    ref = _reference_numpy(PS, z, batch, n_atoms, sparse_points, sp_map, zeta)
    out = jax.block_until_ready(
        sparse_cosine_kernel_forward(PS, z, batch, n_atoms, sparse_points, sp_map, zeta,
                                     env_splits=2))
    np.testing.assert_allclose(np.asarray(out), ref, rtol=5e-2, atol=1.0)

    # ---- test 3: tiny VMEM budget -> tiled S (multiple feat chunks + multiple column tiles)
    n_struct, aps = 2, 100
    n_env, n_feat, zeta = n_struct * aps, 640, 2
    PS = jax.random.normal(k5, (n_env, n_feat), dtype=jnp.float32)
    sparse_points = jax.random.normal(k6, (384, n_feat), dtype=jnp.float32)
    z = jnp.tile(jnp.array([1, 2], dtype=jnp.int32), n_env // 2)
    batch = jnp.repeat(jnp.arange(n_struct, dtype=jnp.int32), aps)
    n_atoms = jnp.full((n_struct,), aps, dtype=jnp.int32)
    sp_map = {1: np.arange(0, 192), 2: np.arange(192, 384)}
    ref = _reference_numpy(PS, z, batch, n_atoms, sparse_points, sp_map, zeta)
    out = jax.block_until_ready(
        sparse_cosine_kernel_forward(PS, z, batch, n_atoms, sparse_points, sp_map, zeta,
                                     vmem_tile_budget_bytes=1 << 20))
    np.testing.assert_allclose(np.asarray(out), ref, rtol=5e-2, atol=1.0)

    print("KERNEL_OK")
</pallas_src>

<mosaic_0001>
module attributes {stable_mosaic.version = 11 : i64} {
  func.func @kernel(%arg0: i32, %arg1: i32, %arg2: i32, %arg3: i32, %arg4: memref<16x128xf32, #tpu.memory_space<vmem>>, %arg5: memref<128x128xf32, #tpu.memory_space<vmem>>, %arg6: memref<16x1xi32, #tpu.memory_space<vmem>>, %arg7: memref<1x16xi32, #tpu.memory_space<vmem>>, %arg8: memref<1x128xi32, #tpu.memory_space<vmem>>, %arg9: memref<1x8x128xf32, #tpu.memory_space<vmem>>, %arg10: memref<16x128xf32, #tpu.memory_space<vmem>>, %arg11: memref<16x128xf32, #tpu.memory_space<vmem>>, %arg12: memref<8x16xf32, #tpu.memory_space<vmem>>) attributes {dimension_semantics = [#tpu.dimension_semantics<parallel>, #tpu.dimension_semantics<parallel>, #tpu.dimension_semantics<arbitrary>, #tpu.dimension_semantics<arbitrary>], iteration_bounds = array<i64: 1, 1, 1, 1>, scalar_prefetch = 0 : i64, scratch_operands = 3 : i64, tpu.core_type = #tpu.core_type<tc>, window_params = [{transform_indices = @transform_0, window_bounds = array<i64: 16, 128>}, {transform_indices = @transform_1, window_bounds = array<i64: 128, 128>}, {transform_indices = @transform_2, window_bounds = array<i64: 16, 1>}, {transform_indices = @transform_3, window_bounds = array<i64: 1, 16>}, {transform_indices = @transform_4, window_bounds = array<i64: 1, 128>}, {transform_indices = @transform_5, window_bounds = array<i64: 1, 8, 128>}]} {
    %c0_i32 = arith.constant 0 : i32
    %0 = arith.cmpi eq, %arg2, %c0_i32 : i32
    %c0_i32_0 = arith.constant 0 : i32
    %1 = arith.cmpi eq, %arg3, %c0_i32_0 : i32
    %2 = arith.andi %0, %1 : i1
    %3 = arith.extui %2 : i1 to i32
    %c0_i32_1 = arith.constant 0 : i32
    %4 = arith.cmpi ne, %3, %c0_i32_1 : i32
    scf.if %4 {
      %cst_31 = arith.constant 0.000000e+00 : f32
      %35 = vector.broadcast %cst_31 : f32 to vector<8x128xf32>
      %c0_32 = arith.constant 0 : index
      %c0_33 = arith.constant 0 : index
      %c0_34 = arith.constant 0 : index
      %36 = vector.load %arg9[%c0_32, %c0_33, %c0_34] : memref<1x8x128xf32, #tpu.memory_space<vmem>>, vector<1x8x128xf32>
      %37 = vector.shape_cast %36 : vector<1x8x128xf32> to vector<8x128xf32>
      %38 = vector.shape_cast %35 : vector<8x128xf32> to vector<1x8x128xf32>
      tpu.vector_store %arg9[%c0_32, %c0_33, %c0_34], %38 {strides = array<i32>} : memref<1x8x128xf32, #tpu.memory_space<vmem>>, vector<1x8x128xf32>,
    } else {
    }
    %c0 = arith.constant 0 : index
    %c0_2 = arith.constant 0 : index
    %5 = vector.load %arg4[%c0, %c0_2] : memref<16x128xf32, #tpu.memory_space<vmem>>, vector<16x128xf32>
    %c0_3 = arith.constant 0 : index
    %c0_4 = arith.constant 0 : index
    %6 = vector.load %arg5[%c0_3, %c0_4] : memref<128x128xf32, #tpu.memory_space<vmem>>, vector<128x128xf32>
    %cst = arith.constant dense<0.000000e+00> : vector<16x128xf32>
    %7 = tpu.matmul %5, %6, %cst {dimension_numbers = #tpu.dot_dimension_numbers<[1], [0], [0], [1], [0, 0, 1, 1], [], []>} : vector<16x128xf32>, vector<128x128xf32>, vector<16x128xf32> -> vector<16x128xf32>
    %c0_5 = arith.constant 0 : index
    %c0_6 = arith.constant 0 : index
    %8 = vector.load %arg10[%c0_5, %c0_6] : memref<16x128xf32, #tpu.memory_space<vmem>>, vector<16x128xf32>
    tpu.vector_store %arg10[%c0_5, %c0_6], %7 {strides = array<i32>} : memref<16x128xf32, #tpu.memory_space<vmem>>, vector<16x128xf32>,
    %c0_7 = arith.constant 0 : index
    %c0_8 = arith.constant 0 : index
    %9 = vector.load %arg10[%c0_7, %c0_8] : memref<16x128xf32, #tpu.memory_space<vmem>>, vector<16x128xf32>
    %10 = arith.mulf %9, %9 : vector<16x128xf32>
    %c0_9 = arith.constant 0 : index
    %c0_10 = arith.constant 0 : index
    %11 = vector.load %arg6[%c0_9, %c0_10] : memref<16x1xi32, #tpu.memory_space<vmem>>, vector<16x1xi32>
    %c0_11 = arith.constant 0 : index
    %c0_12 = arith.constant 0 : index
    %12 = vector.load %arg8[%c0_11, %c0_12] : memref<1x128xi32, #tpu.memory_space<vmem>>, vector<1x128xi32>
    %13 = vector.broadcast %11 : vector<16x1xi32> to vector<16x128xi32>
    %14 = vector.broadcast %12 : vector<1x128xi32> to vector<16x128xi32>
    %15 = arith.cmpi eq, %13, %14 : vector<16x128xi32>
    %cst_13 = arith.constant 0.000000e+00 : f32
    %16 = vector.broadcast %cst_13 : f32 to vector<16x128xf32>
    %17 = arith.select %15, %10, %16 : vector<16x128xi1>, vector<16x128xf32>
    %c0_14 = arith.constant 0 : index
    %c0_15 = arith.constant 0 : index
    %18 = vector.load %arg11[%c0_14, %c0_15] : memref<16x128xf32, #tpu.memory_space<vmem>>, vector<16x128xf32>
    tpu.vector_store %arg11[%c0_14, %c0_15], %17 {strides = array<i32>} : memref<16x128xf32, #tpu.memory_space<vmem>>, vector<16x128xf32>,
    %19 = tpu.iota {dimensions = array<i32: 0>} : vector<8x16xi32>
    %c0_16 = arith.constant 0 : index
    %c0_17 = arith.constant 0 : index
    %20 = vector.load %arg7[%c0_16, %c0_17] : memref<1x16xi32, #tpu.memory_space<vmem>>, vector<1x16xi32>
    %21 = vector.broadcast %20 : vector<1x16xi32> to vector<8x16xi32>
    %22 = arith.cmpi eq, %19, %21 : vector<8x16xi32>
    %23 = arith.extui %22 : vector<8x16xi1> to vector<8x16xi32>
    %24 = arith.sitofp %23 : vector<8x16xi32> to vector<8x16xf32>
    %c0_18 = arith.constant 0 : index
    %c0_19 = arith.constant 0 : index
    %25 = vector.load %arg12[%c0_18, %c0_19] : memref<8x16xf32, #tpu.memory_space<vmem>>, vector<8x16xf32>
    tpu.vector_store %arg12[%c0_18, %c0_19], %24 {strides = array<i32>} : memref<8x16xf32, #tpu.memory_space<vmem>>, vector<8x16xf32>,
    %c0_20 = arith.constant 0 : index
    %c0_21 = arith.constant 0 : index
    %c0_22 = arith.constant 0 : index
    %26 = vector.load %arg9[%c0_20, %c0_21, %c0_22] : memref<1x8x128xf32, #tpu.memory_space<vmem>>, vector<1x8x128xf32>
    %27 = vector.shape_cast %26 : vector<1x8x128xf32> to vector<8x128xf32>
    %c0_23 = arith.constant 0 : index
    %c0_24 = arith.constant 0 : index
    %28 = vector.load %arg12[%c0_23, %c0_24] : memref<8x16xf32, #tpu.memory_space<vmem>>, vector<8x16xf32>
    %c0_25 = arith.constant 0 : index
    %c0_26 = arith.constant 0 : index
    %29 = vector.load %arg11[%c0_25, %c0_26] : memref<16x128xf32, #tpu.memory_space<vmem>>, vector<16x128xf32>
    %cst_27 = arith.constant dense<0.000000e+00> : vector<8x128xf32>
    %30 = tpu.matmul %28, %29, %cst_27 {dimension_numbers = #tpu.dot_dimension_numbers<[1], [0], [0], [1], [0, 0, 1, 1], [], []>} : vector<8x16xf32>, vector<16x128xf32>, vector<8x128xf32> -> vector<8x128xf32>
    %31 = arith.addf %27, %30 : vector<8x128xf32>
    %c0_28 = arith.constant 0 : index
    %c0_29 = arith.constant 0 : index
    %c0_30 = arith.constant 0 : index
    %32 = vector.load %arg9[%c0_28, %c0_29, %c0_30] : memref<1x8x128xf32, #tpu.memory_space<vmem>>, vector<1x8x128xf32>
    %33 = vector.shape_cast %32 : vector<1x8x128xf32> to vector<8x128xf32>
    %34 = vector.shape_cast %31 : vector<8x128xf32> to vector<1x8x128xf32>
    tpu.vector_store %arg9[%c0_28, %c0_29, %c0_30], %34 {strides = array<i32>} : memref<1x8x128xf32, #tpu.memory_space<vmem>>, vector<1x8x128xf32>,
    return
  }
  func.func @transform_0(%arg0: i32, %arg1: i32, %arg2: i32, %arg3: i32) -> (i32, i32) {
    %c1_i32 = arith.constant 1 : i32
    %0 = arith.muli %arg0, %c1_i32 : i32
    %1 = arith.addi %0, %arg2 : i32
    %c0_i32 = arith.constant 0 : i32
    return %1, %arg3 : i32, i32
  }
  func.func @transform_1(%arg0: i32, %arg1: i32, %arg2: i32, %arg3: i32) -> (i32, i32) {
    %c0_i32 = arith.constant 0 : i32
    return %arg3, %arg1 : i32, i32
  }
  func.func @transform_2(%arg0: i32, %arg1: i32, %arg2: i32, %arg3: i32) -> (i32, i32) {
    %c1_i32 = arith.constant 1 : i32
    %0 = arith.muli %arg0, %c1_i32 : i32
    %1 = arith.addi %0, %arg2 : i32
    %c0_i32 = arith.constant 0 : i32
    %c0_i32_0 = arith.constant 0 : i32
    return %1, %c0_i32 : i32, i32
  }
  func.func @transform_3(%arg0: i32, %arg1: i32, %arg2: i32, %arg3: i32) -> (i32, i32) {
    %c1_i32 = arith.constant 1 : i32
    %0 = arith.muli %arg0, %c1_i32 : i32
    %1 = arith.addi %0, %arg2 : i32
    %c0_i32 = arith.constant 0 : i32
    %c0_i32_0 = arith.constant 0 : i32
    return %c0_i32, %1 : i32, i32
  }
  func.func @transform_4(%arg0: i32, %arg1: i32, %arg2: i32, %arg3: i32) -> (i32, i32) {
    %c0_i32 = arith.constant 0 : i32
    %c0_i32_0 = arith.constant 0 : i32
    return %c0_i32, %arg1 : i32, i32
  }
  func.func @transform_5(%arg0: i32, %arg1: i32, %arg2: i32, %arg3: i32) -> (i32, i32, i32) {
    %c0_i32 = arith.constant 0 : i32
    %c0_i32_0 = arith.constant 0 : i32
    return %arg0, %c0_i32, %arg1 : i32, i32, i32
  }
}

</mosaic_0001>

<bundles_post_ra>
// kernel: tpu_custom_call.1
= control target key start
LH: loop header
LB: loop body
LE: loop exit
PB: predicated region body
PF: predicated region fallthrough
CT: control target
= control target key end

     0   :  { %10 = vsyncpa [#allocation6], 0  ;;  %s523_s0 = inlined_call_operand.vmem [shape: f32[16,128], index: 0, kind: input, shape index: {}]   ;;  %s524_s1 = inlined_call_operand.hbm [shape: f32[128,128], index: 1, kind: input, shape index: {}]   ;;  %s525_s2 = inlined_call_operand.vmem [shape: s32[16,1], index: 2, kind: input, shape index: {}]   ;;  %s526_s3 = inlined_call_operand.vmem [shape: s32[1,16], index: 3, kind: input, shape index: {}]   ;;  %s527_s4 = inlined_call_operand.vmem [shape: s32[1,128], index: 4, kind: input, shape index: {}]   ;;  %s528_s5 = inlined_call_operand.hbm [shape: f32[1,8,128], index: 5, kind: output, shape index: {}]  }
   0x1   :  { %11 = vsyncpa [#allocation7], 0  ;;  %s460_s18 = smov [#allocation5]  }
   0x2   :  { %s27_s19 = sshll.u32 %s460_s18, 4  ;;  %s28_s19 = int_to_ptr.vmem [resolvable:$true] %s27_s19 }
   0x3   :  { %s424_s20 = scalar_lea.vmem %s28_s19, 2048  ;;  %p429_p1 = scmp.lt.s32.totalorder %s28_s19, %s28_s19 }
   0x4   :  { %p425_p0 = scmp.ne.s32.totalorder %s28_s19, %s424_s20  ;;  %p430_p2 = scmp.lt.s32.totalorder %s424_s20, %s424_s20 }
   0x6   :  { %p431_p3 = por %p430_p2, %p429_p1 }
   0x8   :  { %p432_p4 = pnand %p431_p3, %p425_p0 }
   0xa   :  { %435 = shalt.err (!%p432_p4)
}
   0xb   :  { %s461_s21 = smov 128   ;;  %s462_s22 = smov 8  }
   0xc   :  { %33 = dma.hbm_to_vmem [thread:$0]  %s524_s1, 2048, %s28_s19, [#allocation6], %s461_s21, %s461_s21, %s462_s22  }
   0xd   :  { %456 = dma.done.wait [#allocation6], 2048  }
   0xe   :  { %457 = vsyncadd [#allocation6], 4294965248  ;;  %v463_v0 = vmov 0   ;;  %v117_v1 = vld [vmem:[#allocation5 + $0x78] sm:$0xff]  ;;  %v116_v2 = vld [vmem:[#allocation5 + $0x70] sm:$0xff]  ;;  %v218_v21 = vlaneseq  ;;  %v464_v24 = vmov 0.0  }
   0xf   :  { %415 = vset.pattern.permute.xlu0 %v463_v0  ;;  %366 = vmatprep.subr.mxu0 %v117_v1  ;;  %v115_v3 = vld [vmem:[#allocation5 + $0x68] sm:$0xff]  ;;  %v114_v4 = vld [vmem:[#allocation5 + $0x60] sm:$0xff]  ;;  %v100_v5 = vld [vmem:[%s523_s0] sm:$0xff]  ;;  %vm228_vm1 = vcmask 130048   ;;  %vm465_vm2 = vmmov 0  }
  0x10   :  { %367 = vmatpush3.msra.mxu0 %v117_v1  ;;  %v113_v6 = vld [vmem:[#allocation5 + $0x58] sm:$0xff]  ;;  %398 = vmatprep.mubr.f32.mxu0 %v100_v5  ;;  %v200_v7 = vld [vmem:[%s525_s2 + $0x8] sm:$0xff]  ;;  %v112_v8 = vld [vmem:[#allocation5 + $0x50] sm:$0xff]  ;;  %v219_v22 = vshrl.u32 %v218_v21, 7 }
  0x11   :  { %368 = vmatprep.subr.mxu0 %v116_v2  ;;  %206 = vperm.xlu0 %415, %v200_v7   ;;  %v199_v9 = vld [vmem:[%s525_s2] sm:$0xff]  ;;  %v111_v10 = vld [vmem:[#allocation5 + $0x48] sm:$0xff]  ;;  %v110_v11 = vld [vmem:[#allocation5 + $0x40] sm:$0xff] }
  0x12   :  { %369 = vmatpush3.msra.mxu0 %v116_v2  ;;  %v109_v12 = vld [vmem:[#allocation5 + $0x38] sm:$0xff]  ;;  %v108_v13 = vld [vmem:[#allocation5 + $0x30] sm:$0xff]  ;;  %v107_v14 = vld [vmem:[#allocation5 + $0x28] sm:$0xff]  ;;  %401 = vmatprep.subr.mxu1 %v464_v24 }
  0x13   :  { %370 = vmatprep.subr.mxu0 %v115_v3  ;;  %v106_v15 = vld [vmem:[#allocation5 + $0x20] sm:$0xff]  ;;  %v105_v16 = vld [vmem:[#allocation5 + $0x18] sm:$0xff]  ;;  %v104_v17 = vld [vmem:[#allocation5 + $0x10] sm:$0xff]  ;;  %405 = vmatprep.mubr.msk.f32.mxu1 %vm465_vm2, %v464_v24 }
  0x14   :  { %371 = vmatpush3.msra.mxu0 %v115_v3  ;;  %v103_v18 = vld [vmem:[#allocation5 + $0x8] sm:$0xff]  ;;  %v102_v19 = vld [vmem:[#allocation5] sm:$0xff]  ;;  %v340_v23 = vld [vmem:[%s526_s3] ss:$0 sm:$0xff]  ;;  %s466_s3 = smov [#allocation8]  }
  0x15   :  { %372 = vmatprep.subr.mxu0 %v114_v4  ;;  %203 = vperm.xlu0 %415, %v199_v9   ;;  %v101_v20 = vld [vmem:[%s523_s0 + $0x8] sm:$0xff]  ;;  %vm225_vm0 = vcmp.eq.s32.totalorder %v219_v22, %v340_v23  ;;  %v339_v27 = vld [vmem:[%s527_s4] ss:$0 sm:$0xff]  ;;  %s315_s9 = sshll.u32 %s466_s3, 4  ;;  %s316_s9 = int_to_ptr.vmem [resolvable:$true] %s315_s9 }
  0x16   :  { %373 = vmatpush3.msra.mxu0 %v114_v4  ;;  %v341_v25 = vsel %vm225_vm0, 1.0, %v464_v24  ;;  %s436_s4 = scalar_lea.vmem %s316_s9, 128  ;;  %p441_p6 = scmp.lt.s32.totalorder %s316_s9, %s316_s9 }
  0x17   :  { %374 = vmatprep.subr.mxu0 %v113_v6  ;;  %229 = vst.msk [vmem:[#allocation4] sm:$0xff] %vm228_vm1, %v341_v25  ;;  %p437_p5 = scmp.ne.s32.totalorder %s316_s9, %s436_s4  ;;  %p442_p7 = scmp.lt.s32.totalorder %s436_s4, %s436_s4 }
  0x18   :  { %375 = vmatpush3.msra.mxu0 %v113_v6 }
  0x19   :  { %376 = vmatprep.subr.mxu0 %v112_v8  ;;  %p443_p8 = por %p442_p7, %p441_p6 }
  0x1a   :  { %377 = vmatpush3.msra.mxu0 %v112_v8 }
  0x1b   :  { %378 = vmatprep.subr.mxu0 %v111_v10  ;;  %p444_p9 = pnand %p443_p8, %p437_p5 }
  0x1c   :  { %379 = vmatpush3.msra.mxu0 %v111_v10 }
  0x1d   :  { %380 = vmatprep.subr.mxu0 %v110_v11 }
  0x1e   :  { %381 = vmatpush3.msra.mxu0 %v110_v11  ;;  %v231_v33 = vld [vmem:[#allocation4] sm:$0xff] }
  0x1f   :  { %382 = vmatprep.subr.mxu0 %v109_v12 }
  0x20   :  { %383 = vmatpush3.msra.mxu0 %v109_v12 }
  0x21   :  { %384 = vmatprep.subr.mxu0 %v108_v13 }
  0x22   :  { %385 = vmatpush3.msra.mxu0 %v108_v13 }
  0x23   :  { %386 = vmatprep.subr.mxu0 %v107_v14 }
  0x24   :  { %387 = vmatpush3.msra.mxu0 %v107_v14 }
  0x25   :  { %388 = vmatprep.subr.mxu0 %v106_v15 }
  0x26   :  { %389 = vmatpush3.msra.mxu0 %v106_v15 }
  0x27   :  { %390 = vmatprep.subr.mxu0 %v105_v16 }
  0x28   :  { %391 = vmatpush3.msra.mxu0 %v105_v16 }
  0x29   :  { %392 = vmatprep.subr.mxu0 %v104_v17 }
  0x2a   :  { %393 = vmatpush3.msra.mxu0 %v104_v17 }
  0x2b   :  { %394 = vmatprep.subr.mxu0 %v103_v18 }
  0x2c   :  { %395 = vmatpush3.msra.mxu0 %v103_v18 }
  0x2d   :  { %396 = vmatprep.subr.mxu0 %v102_v19 }
  0x2e   :  { %397 = vmatpush3.msra.mxu0 %v102_v19 }
  0x2f   :  { %399 = vmatmul.mubr.f32.vlgmr.msra.gmra.mxu0 %v101_v20 }
  0x8c   :  { %v207_v26 = vpop.permute.xlu0 %206 }
  0x8d   :  { %vm213_vm3 = vcmp.eq.s32.totalorder %v207_v26, %v339_v27 }
  0x90   :  { %v204_v29 = vpop.permute.xlu0 %203 }
  0x91   :  { %vm212_vm4 = vcmp.eq.s32.totalorder %v204_v29, %v339_v27 }
  0xef   :  { %v400_v28 = vpop.f32.mrf.mxu0 }
  0xf0   :  { %v198_v30 = vmul.f32 %v400_v28, %v400_v28 }
  0xf1   :  { %v184_v31 = vpop.f32.mrf.mxu0 }
  0xf2   :  { %v197_v32 = vmul.f32 %v184_v31, %v184_v31  ;;  %402 = vmatpush3.msk.msra.mxu1 %vm213_vm3, %v198_v30 }
  0xf3   :  { %403 = vmatprep.subr.mxu1 %v464_v24 }
  0xf4   :  { %404 = vmatpush3.msk.msra.mxu1 %vm212_vm4, %v197_v32 }
  0xf5   :  { %406 = vmatmul.mubr.msk.f32.vlgmr.msra.gmra.mxu1 %vm228_vm1, %v231_v33 }
 0x1b5   :  { %v303_v34 = vpop.f32.mrf.mxu1 }
 0x1b6   :  { %308 = vst [vmem:[#allocation8] sm:$0xff] %v303_v34 }
 0x1b7   :  { %v407_v35 = vpop.f32.mrf.mxu1 }
 0x1b8   :  { %447 = shalt.err (!%p444_p9)
}
 0x1b9   :  { %318 = dma.vmem_to_hbm [thread:$0]  %s316_s9, 128, %s528_s5, [#allocation7]  }
 0x1ba   :  { %458 = dma.done.wait [#allocation7], 128  }
 0x1bb   :  { %459 = vsyncadd [#allocation7], 4294967168 }
 0x1bc   :  { %322 = vsyncpa [#allocation6], 1 }
 0x1bd   :  { %323 = vsyncpa [#allocation7], 1 }

</bundles_post_ra>
